<compile_context>
chip_gen: v7x
topology: tpu7x:2x2x1
jax: 0.10.0
libtpu: 0.0.40
codegen_flags: <defaults>
</compile_context>

<pallas_src>
import functools

import jax
import jax.numpy as jnp
from jax.experimental import pallas as pl
from jax.experimental.pallas import tpu as pltpu

_NEG_BIG = -1e30  # finite "-inf" sentinel: avoids inf*0 -> NaN in the updates


def _vrlwr_kernel(new_ref, old_ref, out_ref,
                  m_new_ref, m_old_ref, z_new_ref, z_old_ref, s_ref,
                  *, d0: int, d1: int, chunk_d0: int, tile_d1: int):
    i = pl.program_id(0)            # D1 tile (parallel)
    k = pl.program_id(1)            # D0 chunk (arbitrary / reduction)
    num_k = pl.num_programs(1)

    @pl.when(k == 0)
    def _init():
        m_new_ref[...] = jnp.full_like(m_new_ref, _NEG_BIG)
        m_old_ref[...] = jnp.full_like(m_old_ref, _NEG_BIG)
        z_new_ref[...] = jnp.zeros_like(z_new_ref)
        z_old_ref[...] = jnp.zeros_like(z_old_ref)
        s_ref[...] = jnp.zeros_like(s_ref)

    xn = new_ref[...].astype(jnp.float32)        # [CHUNK, TILE]
    xo = old_ref[...].astype(jnp.float32)        # [CHUNK, TILE]

    # Mask rows past d0 (ragged last D0 chunk reads garbage that would corrupt
    # every valid column). Static no-op when the chunk divides d0.
    if d0 % chunk_d0 != 0:
        row = k * chunk_d0 + jax.lax.broadcasted_iota(
            jnp.int32, (chunk_d0, tile_d1), 0)
        row_ok = row < d0
        xn = jnp.where(row_ok, xn, _NEG_BIG)
        xo = jnp.where(row_ok, xo, _NEG_BIG)

    m_new_prev = m_new_ref[...]                  # [1, TILE]
    m_old_prev = m_old_ref[...]
    z_new_prev = z_new_ref[...]
    z_old_prev = z_old_ref[...]
    s_prev = s_ref[...]

    m_new = jnp.maximum(m_new_prev, jnp.max(xn, axis=0, keepdims=True))
    m_old = jnp.maximum(m_old_prev, jnp.max(xo, axis=0, keepdims=True))

    a_new = jnp.exp(m_new_prev - m_new)          # rescale factors, [1, TILE]
    a_old = jnp.exp(m_old_prev - m_old)

    e_new = jnp.exp(xn - m_new)                  # [CHUNK, TILE]
    sh_old = xo - m_old                          # [CHUNK, TILE]

    z_new = a_new * z_new_prev + jnp.sum(e_new, axis=0, keepdims=True)
    z_old = a_old * z_old_prev + jnp.sum(jnp.exp(sh_old), axis=0, keepdims=True)
    # S_prev was relative to (m_new_prev, m_old_prev); rescale + shift it.
    s_new = (a_new * (s_prev + (m_old_prev - m_old) * z_new_prev)
             + jnp.sum(e_new * sh_old, axis=0, keepdims=True))

    m_new_ref[...] = m_new
    m_old_ref[...] = m_old
    z_new_ref[...] = z_new
    z_old_ref[...] = z_old
    s_ref[...] = s_new

    @pl.when(k == num_k - 1)
    def _finalize():
        # per_col = log(Z_old) - S / Z_new
        per_col = (jnp.log(z_old_ref[...])
                   - s_ref[...] * pl.reciprocal(z_new_ref[...], approx=False))
        if d1 % tile_d1 != 0:
            col = i * tile_d1 + jax.lax.broadcasted_iota(
                jnp.int32, (1, tile_d1), 1)
            per_col = jnp.where(col < d1, per_col, 0.0)
        out_ref[...] = per_col


def _round_up(x: int, m: int) -> int:
    return (x + m - 1) // m * m


def _vmem_capacity_bytes() -> int:
    try:
        info = pltpu.get_tpu_info()
        cap = getattr(info, "vmem_capacity_bytes", None)
        if cap:
            return int(cap)
    except Exception:
        pass
    try:
        kind = jax.devices()[0].device_kind.lower()
        if "v5" in kind or "v6" in kind:
            return 128 * 1024 * 1024
    except Exception:
        pass
    return 64 * 1024 * 1024  # conservative (v7x per-TensorCore)


def _pick_tiles(d0: int, d1: int, itemsize: int, cap: int,
                tile_d1=None, chunk_d0=None):
    """Pick (tile_d1, chunk_d0, vmem_limit) so double-buffered inputs plus
    f32 intermediates fit the scoped VMEM limit on every chip generation."""
    vmem_limit = min(int(cap * 0.75), cap - (16 << 20))
    if tile_d1 is None:
        tile = min(_round_up(d1, 128), 1024)
    else:
        tile = int(tile_d1)
        if tile % 128 != 0:
            raise ValueError("tile_d1 must be a multiple of 128")
    if chunk_d0 is None:
        # Per chunk-row: 2 inputs x 2 pipeline buffers (native dtype) plus
        # ~6 live [CHUNK, TILE] f32 intermediates inside the kernel body.
        row_bytes = tile * (2 * 2 * itemsize + 6 * 4)
        chunk = int(vmem_limit * 0.6) // row_bytes
        chunk = max(8, min(chunk // 8 * 8, 4096))
    else:
        chunk = int(chunk_d0)
        if chunk % 8 != 0:
            raise ValueError("chunk_d0 must be a multiple of 8")
    chunk = min(chunk, _round_up(d0, 8))
    return tile, chunk, vmem_limit


def vrlwr_loss(logits_per_vr_new: jax.Array,
               logits_per_vr_old: jax.Array,
               *, tile_d1: int | None = None,
               chunk_d0: int | None = None) -> jax.Array:
    """Pallas implementation of the VRLwR forward pass. Returns an f32 scalar."""
    assert logits_per_vr_new.shape == logits_per_vr_old.shape
    d0 = logits_per_vr_new.shape[0]
    # softmax is over dim 0 and the mean is over everything else, so flattening
    # trailing axes is semantics-preserving.
    x_new = logits_per_vr_new.reshape(d0, -1)
    x_old = logits_per_vr_old.reshape(d0, -1)
    d1 = x_new.shape[1]

    itemsize = max(jnp.dtype(x_new.dtype).itemsize,
                   jnp.dtype(x_old.dtype).itemsize)
    cap = _vmem_capacity_bytes()
    tile, chunk, vmem_limit = _pick_tiles(d0, d1, itemsize, cap,
                                          tile_d1=tile_d1, chunk_d0=chunk_d0)

    num_d1 = pl.cdiv(d1, tile)
    num_k = pl.cdiv(d0, chunk)

    kernel = functools.partial(_vrlwr_kernel, d0=d0, d1=d1,
                               chunk_d0=chunk, tile_d1=tile)

    per_col = pl.pallas_call(
        kernel,
        out_shape=jax.ShapeDtypeStruct((1, d1), jnp.float32),
        grid_spec=pltpu.PrefetchScalarGridSpec(
            num_scalar_prefetch=0,
            grid=(num_d1, num_k),
            in_specs=[
                pl.BlockSpec((chunk, tile), lambda i, k: (k, i)),
                pl.BlockSpec((chunk, tile), lambda i, k: (k, i)),
            ],
            out_specs=pl.BlockSpec((1, tile), lambda i, k: (0, i)),
            scratch_shapes=[pltpu.VMEM((1, tile), jnp.float32)
                            for _ in range(5)],
        ),
        compiler_params=pltpu.CompilerParams(
            dimension_semantics=("parallel", "arbitrary"),
            vmem_limit_bytes=int(vmem_limit),
        ),
    )(x_new, x_old)

    # Tiny final reduction + mean over the true column count.
    return jnp.sum(per_col) / jnp.float32(d1)


def _vrlwr_ref(new, old):
    """Pure-JAX reference for verification."""
    d0 = new.shape[0]
    new = new.reshape(d0, -1).astype(jnp.float32)
    old = old.reshape(d0, -1).astype(jnp.float32)
    p_new = jax.nn.softmax(new, axis=0)
    log_p_old = jax.nn.log_softmax(old, axis=0)
    return jnp.mean(jnp.sum(-p_new * log_p_old, axis=0))


if __name__ == "__main__":
    key = jax.random.PRNGKey(0)
    k1, k2, k3, k4, k5, k6 = jax.random.split(key, 6)

    # [replayed_vocab, batch] — small smoke-test shape consistent with the module.
    new = jax.random.normal(k1, (16, 8), dtype=jnp.float32)
    old = jax.random.normal(k2, (16, 8), dtype=jnp.float32)
    out = jax.block_until_ready(vrlwr_loss(new, old))
    ref = _vrlwr_ref(new, old)
    assert jnp.allclose(out, ref, rtol=2e-5, atol=2e-5), (out, ref)

    # Multi-tile D1 (ragged last lane tile) + multi-chunk D0 online softmax.
    new2 = jax.random.normal(k3, (32, 300), dtype=jnp.float32)
    old2 = jax.random.normal(k4, (32, 300), dtype=jnp.float32)
    out2 = jax.block_until_ready(vrlwr_loss(new2, old2, tile_d1=128, chunk_d0=8))
    ref2 = _vrlwr_ref(new2, old2)
    assert jnp.allclose(out2, ref2, rtol=2e-5, atol=2e-5), (out2, ref2)

    # bf16 inputs + ragged last D0 chunk (row-mask path) + ragged D1.
    new3 = jax.random.normal(k5, (40, 130), dtype=jnp.float32).astype(jnp.bfloat16)
    old3 = jax.random.normal(k6, (40, 130), dtype=jnp.float32).astype(jnp.bfloat16)
    out3 = jax.block_until_ready(vrlwr_loss(new3, old3, chunk_d0=16))
    ref3 = _vrlwr_ref(new3, old3)
    assert jnp.allclose(out3, ref3, rtol=2e-5, atol=2e-5), (out3, ref3)

    print("KERNEL_OK")
</pallas_src>

<mosaic_0001>
module attributes {stable_mosaic.version = 11 : i64} {
  func.func @_vrlwr_kernel(%arg0: i32, %arg1: i32, %arg2: memref<16x128xf32, #tpu.memory_space<vmem>>, %arg3: memref<16x128xf32, #tpu.memory_space<vmem>>, %arg4: memref<1x128xf32, #tpu.memory_space<vmem>>, %arg5: memref<1x128xf32, #tpu.memory_space<vmem>>, %arg6: memref<1x128xf32, #tpu.memory_space<vmem>>, %arg7: memref<1x128xf32, #tpu.memory_space<vmem>>, %arg8: memref<1x128xf32, #tpu.memory_space<vmem>>, %arg9: memref<1x128xf32, #tpu.memory_space<vmem>>) attributes {dimension_semantics = [#tpu.dimension_semantics<parallel>, #tpu.dimension_semantics<arbitrary>], iteration_bounds = array<i64: 1, 1>, scalar_prefetch = 0 : i64, scratch_operands = 5 : i64, tpu.core_type = #tpu.core_type<tc>, window_params = [{transform_indices = @transform_0, window_bounds = array<i64: 16, 128>}, {transform_indices = @transform_1, window_bounds = array<i64: 16, 128>}, {transform_indices = @transform_2, window_bounds = array<i64: 1, 128>}]} {
    %c0_i32 = arith.constant 0 : i32
    %0 = arith.cmpi eq, %arg1, %c0_i32 : i32
    %1 = arith.extui %0 : i1 to i32
    %c0_i32_0 = arith.constant 0 : i32
    %2 = arith.cmpi ne, %1, %c0_i32_0 : i32
    scf.if %2 {
      %cst_30 = arith.constant -1.000000e+30 : f32
      %50 = vector.broadcast %cst_30 : f32 to vector<1x128xf32>
      %c0_31 = arith.constant 0 : index
      %c0_32 = arith.constant 0 : index
      %51 = vector.load %arg5[%c0_31, %c0_32] : memref<1x128xf32, #tpu.memory_space<vmem>>, vector<1x128xf32>
      tpu.vector_store %arg5[%c0_31, %c0_32], %50 {strides = array<i32>} : memref<1x128xf32, #tpu.memory_space<vmem>>, vector<1x128xf32>,
      %cst_33 = arith.constant -1.000000e+30 : f32
      %52 = vector.broadcast %cst_33 : f32 to vector<1x128xf32>
      %c0_34 = arith.constant 0 : index
      %c0_35 = arith.constant 0 : index
      %53 = vector.load %arg6[%c0_34, %c0_35] : memref<1x128xf32, #tpu.memory_space<vmem>>, vector<1x128xf32>
      tpu.vector_store %arg6[%c0_34, %c0_35], %52 {strides = array<i32>} : memref<1x128xf32, #tpu.memory_space<vmem>>, vector<1x128xf32>,
      %cst_36 = arith.constant 0.000000e+00 : f32
      %54 = vector.broadcast %cst_36 : f32 to vector<1x128xf32>
      %c0_37 = arith.constant 0 : index
      %c0_38 = arith.constant 0 : index
      %55 = vector.load %arg7[%c0_37, %c0_38] : memref<1x128xf32, #tpu.memory_space<vmem>>, vector<1x128xf32>
      tpu.vector_store %arg7[%c0_37, %c0_38], %54 {strides = array<i32>} : memref<1x128xf32, #tpu.memory_space<vmem>>, vector<1x128xf32>,
      %cst_39 = arith.constant 0.000000e+00 : f32
      %56 = vector.broadcast %cst_39 : f32 to vector<1x128xf32>
      %c0_40 = arith.constant 0 : index
      %c0_41 = arith.constant 0 : index
      %57 = vector.load %arg8[%c0_40, %c0_41] : memref<1x128xf32, #tpu.memory_space<vmem>>, vector<1x128xf32>
      tpu.vector_store %arg8[%c0_40, %c0_41], %56 {strides = array<i32>} : memref<1x128xf32, #tpu.memory_space<vmem>>, vector<1x128xf32>,
      %cst_42 = arith.constant 0.000000e+00 : f32
      %58 = vector.broadcast %cst_42 : f32 to vector<1x128xf32>
      %c0_43 = arith.constant 0 : index
      %c0_44 = arith.constant 0 : index
      %59 = vector.load %arg9[%c0_43, %c0_44] : memref<1x128xf32, #tpu.memory_space<vmem>>, vector<1x128xf32>
      tpu.vector_store %arg9[%c0_43, %c0_44], %58 {strides = array<i32>} : memref<1x128xf32, #tpu.memory_space<vmem>>, vector<1x128xf32>,
    } else {
    }
    %c0 = arith.constant 0 : index
    %c0_1 = arith.constant 0 : index
    %3 = vector.load %arg2[%c0, %c0_1] : memref<16x128xf32, #tpu.memory_space<vmem>>, vector<16x128xf32>
    %c0_2 = arith.constant 0 : index
    %c0_3 = arith.constant 0 : index
    %4 = vector.load %arg3[%c0_2, %c0_3] : memref<16x128xf32, #tpu.memory_space<vmem>>, vector<16x128xf32>
    %c0_4 = arith.constant 0 : index
    %c0_5 = arith.constant 0 : index
    %5 = vector.load %arg5[%c0_4, %c0_5] : memref<1x128xf32, #tpu.memory_space<vmem>>, vector<1x128xf32>
    %c0_6 = arith.constant 0 : index
    %c0_7 = arith.constant 0 : index
    %6 = vector.load %arg6[%c0_6, %c0_7] : memref<1x128xf32, #tpu.memory_space<vmem>>, vector<1x128xf32>
    %c0_8 = arith.constant 0 : index
    %c0_9 = arith.constant 0 : index
    %7 = vector.load %arg7[%c0_8, %c0_9] : memref<1x128xf32, #tpu.memory_space<vmem>>, vector<1x128xf32>
    %c0_10 = arith.constant 0 : index
    %c0_11 = arith.constant 0 : index
    %8 = vector.load %arg8[%c0_10, %c0_11] : memref<1x128xf32, #tpu.memory_space<vmem>>, vector<1x128xf32>
    %c0_12 = arith.constant 0 : index
    %c0_13 = arith.constant 0 : index
    %9 = vector.load %arg9[%c0_12, %c0_13] : memref<1x128xf32, #tpu.memory_space<vmem>>, vector<1x128xf32>
    %cst = arith.constant dense<0xFF800000> : vector<128xf32>
    %10 = vector.multi_reduction <maximumf>, %3, %cst [0] : vector<16x128xf32> to vector<128xf32>
    %11 = vector.shape_cast %10 : vector<128xf32> to vector<1x128xf32>
    %12 = arith.maximumf %5, %11 : vector<1x128xf32>
    %cst_14 = arith.constant dense<0xFF800000> : vector<128xf32>
    %13 = vector.multi_reduction <maximumf>, %4, %cst_14 [0] : vector<16x128xf32> to vector<128xf32>
    %14 = vector.shape_cast %13 : vector<128xf32> to vector<1x128xf32>
    %15 = arith.maximumf %6, %14 : vector<1x128xf32>
    %16 = arith.subf %5, %12 : vector<1x128xf32>
    %17 = math.exp %16 : vector<1x128xf32>
    %18 = arith.subf %6, %15 : vector<1x128xf32>
    %19 = math.exp %18 : vector<1x128xf32>
    %20 = vector.broadcast %12 : vector<1x128xf32> to vector<16x128xf32>
    %21 = arith.subf %3, %20 : vector<16x128xf32>
    %22 = math.exp %21 : vector<16x128xf32>
    %23 = vector.broadcast %15 : vector<1x128xf32> to vector<16x128xf32>
    %24 = arith.subf %4, %23 : vector<16x128xf32>
    %25 = arith.mulf %17, %7 : vector<1x128xf32>
    %cst_15 = arith.constant dense<0.000000e+00> : vector<128xf32>
    %26 = vector.multi_reduction <add>, %22, %cst_15 [0] : vector<16x128xf32> to vector<128xf32>
    %27 = vector.shape_cast %26 : vector<128xf32> to vector<1x128xf32>
    %28 = arith.addf %25, %27 : vector<1x128xf32>
    %29 = arith.mulf %19, %8 : vector<1x128xf32>
    %30 = math.exp %24 : vector<16x128xf32>
    %cst_16 = arith.constant dense<0.000000e+00> : vector<128xf32>
    %31 = vector.multi_reduction <add>, %30, %cst_16 [0] : vector<16x128xf32> to vector<128xf32>
    %32 = vector.shape_cast %31 : vector<128xf32> to vector<1x128xf32>
    %33 = arith.addf %29, %32 : vector<1x128xf32>
    %34 = arith.subf %6, %15 : vector<1x128xf32>
    %35 = arith.mulf %34, %7 : vector<1x128xf32>
    %36 = arith.addf %9, %35 : vector<1x128xf32>
    %37 = arith.mulf %17, %36 : vector<1x128xf32>
    %38 = arith.mulf %22, %24 : vector<16x128xf32>
    %cst_17 = arith.constant dense<0.000000e+00> : vector<128xf32>
    %39 = vector.multi_reduction <add>, %38, %cst_17 [0] : vector<16x128xf32> to vector<128xf32>
    %40 = vector.shape_cast %39 : vector<128xf32> to vector<1x128xf32>
    %41 = arith.addf %37, %40 : vector<1x128xf32>
    %c0_18 = arith.constant 0 : index
    %c0_19 = arith.constant 0 : index
    %42 = vector.load %arg5[%c0_18, %c0_19] : memref<1x128xf32, #tpu.memory_space<vmem>>, vector<1x128xf32>
    tpu.vector_store %arg5[%c0_18, %c0_19], %12 {strides = array<i32>} : memref<1x128xf32, #tpu.memory_space<vmem>>, vector<1x128xf32>,
    %c0_20 = arith.constant 0 : index
    %c0_21 = arith.constant 0 : index
    %43 = vector.load %arg6[%c0_20, %c0_21] : memref<1x128xf32, #tpu.memory_space<vmem>>, vector<1x128xf32>
    tpu.vector_store %arg6[%c0_20, %c0_21], %15 {strides = array<i32>} : memref<1x128xf32, #tpu.memory_space<vmem>>, vector<1x128xf32>,
    %c0_22 = arith.constant 0 : index
    %c0_23 = arith.constant 0 : index
    %44 = vector.load %arg7[%c0_22, %c0_23] : memref<1x128xf32, #tpu.memory_space<vmem>>, vector<1x128xf32>
    tpu.vector_store %arg7[%c0_22, %c0_23], %28 {strides = array<i32>} : memref<1x128xf32, #tpu.memory_space<vmem>>, vector<1x128xf32>,
    %c0_24 = arith.constant 0 : index
    %c0_25 = arith.constant 0 : index
    %45 = vector.load %arg8[%c0_24, %c0_25] : memref<1x128xf32, #tpu.memory_space<vmem>>, vector<1x128xf32>
    tpu.vector_store %arg8[%c0_24, %c0_25], %33 {strides = array<i32>} : memref<1x128xf32, #tpu.memory_space<vmem>>, vector<1x128xf32>,
    %c0_26 = arith.constant 0 : index
    %c0_27 = arith.constant 0 : index
    %46 = vector.load %arg9[%c0_26, %c0_27] : memref<1x128xf32, #tpu.memory_space<vmem>>, vector<1x128xf32>
    tpu.vector_store %arg9[%c0_26, %c0_27], %41 {strides = array<i32>} : memref<1x128xf32, #tpu.memory_space<vmem>>, vector<1x128xf32>,
    %c0_i32_28 = arith.constant 0 : i32
    %47 = arith.cmpi eq, %arg1, %c0_i32_28 : i32
    %48 = arith.extui %47 : i1 to i32
    %c0_i32_29 = arith.constant 0 : i32
    %49 = arith.cmpi ne, %48, %c0_i32_29 : i32
    scf.if %49 {
      %c0_30 = arith.constant 0 : index
      %c0_31 = arith.constant 0 : index
      %50 = vector.load %arg8[%c0_30, %c0_31] : memref<1x128xf32, #tpu.memory_space<vmem>>, vector<1x128xf32>
      %51 = math.log %50 : vector<1x128xf32>
      %c0_32 = arith.constant 0 : index
      %c0_33 = arith.constant 0 : index
      %52 = vector.load %arg9[%c0_32, %c0_33] : memref<1x128xf32, #tpu.memory_space<vmem>>, vector<1x128xf32>
      %c0_34 = arith.constant 0 : index
      %c0_35 = arith.constant 0 : index
      %53 = vector.load %arg7[%c0_34, %c0_35] : memref<1x128xf32, #tpu.memory_space<vmem>>, vector<1x128xf32>
      %54 = tpu.reciprocal %53 : vector<1x128xf32> -> vector<1x128xf32>
      %55 = arith.mulf %52, %54 : vector<1x128xf32>
      %56 = arith.subf %51, %55 : vector<1x128xf32>
      %c128_i32 = arith.constant 128 : i32
      %57 = arith.muli %arg0, %c128_i32 : i32
      %58 = tpu.iota {dimensions = array<i32: 1>} : vector<1x128xi32>
      %59 = vector.broadcast %57 : i32 to vector<1x128xi32>
      %60 = arith.addi %59, %58 : vector<1x128xi32>
      %c8_i32 = arith.constant 8 : i32
      %61 = vector.broadcast %c8_i32 : i32 to vector<1x128xi32>
      %62 = arith.cmpi slt, %60, %61 : vector<1x128xi32>
      %cst_36 = arith.constant 0.000000e+00 : f32
      %63 = vector.broadcast %cst_36 : f32 to vector<1x128xf32>
      %64 = arith.select %62, %56, %63 : vector<1x128xi1>, vector<1x128xf32>
      %c0_37 = arith.constant 0 : index
      %c0_38 = arith.constant 0 : index
      %65 = vector.load %arg4[%c0_37, %c0_38] : memref<1x128xf32, #tpu.memory_space<vmem>>, vector<1x128xf32>
      tpu.vector_store %arg4[%c0_37, %c0_38], %64 {strides = array<i32>} : memref<1x128xf32, #tpu.memory_space<vmem>>, vector<1x128xf32>,
    } else {
    }
    return
  }
  func.func @transform_0(%arg0: i32, %arg1: i32) -> (i32, i32) {
    %c0_i32 = arith.constant 0 : i32
    return %arg1, %arg0 : i32, i32
  }
  func.func @transform_1(%arg0: i32, %arg1: i32) -> (i32, i32) {
    %c0_i32 = arith.constant 0 : i32
    return %arg1, %arg0 : i32, i32
  }
  func.func @transform_2(%arg0: i32, %arg1: i32) -> (i32, i32) {
    %c0_i32 = arith.constant 0 : i32
    %c0_i32_0 = arith.constant 0 : i32
    return %c0_i32, %arg0 : i32, i32
  }
}

</mosaic_0001>

<bundles_post_ra>
// kernel: tpu_custom_call.1
= control target key start
LH: loop header
LB: loop body
LE: loop exit
PB: predicated region body
PF: predicated region fallthrough
CT: control target
= control target key end

     0   :  { %v188_v3 = vmov -1e+30   ;;  %v189_v4 = vmov 0.0   ;;  %s232_s0 = inlined_call_operand.vmem [shape: f32[16,8], index: 0, kind: input, shape index: {}]   ;;  %s233_s1 = inlined_call_operand.vmem [shape: f32[16,8], index: 1, kind: input, shape index: {}]   ;;  %s234_s2 = inlined_call_operand.hbm [shape: f32[1,8], index: 2, kind: output, shape index: {}]  }
   0x1   :  { %v21_v0 = vld [vmem:[%s232_s0] sm:$0xff]  ;;  %v22_v1 = vld [vmem:[%s232_s0 + $0x8] sm:$0xff]  ;;  %16 = vst [vmem:[#allocation2] sm:$0x1] %v188_v3  ;;  %17 = vst [vmem:[#allocation3] sm:$0x1] %v188_v3 }
   0x2   :  { %v23_v2 = vld [vmem:[%s233_s1] sm:$0xff]  ;;  %18 = vst [vmem:[#allocation4] sm:$0x1] %v189_v4  ;;  %19 = vst [vmem:[#allocation5] sm:$0x1] %v189_v4  ;;  %v30_v5 = vmax.f32 %v21_v0, %v22_v1  ;;  %v24_v6 = vld [vmem:[%s233_s1 + $0x8] sm:$0xff] }
   0x3   :  { %20 = vst [vmem:[#allocation6] sm:$0x1] %v189_v4 }
   0x4   :  { %7 = vsyncpa [#allocation8], 0  ;;  %v38_v7 = vmax.f32 %v23_v2, %v24_v6  ;;  %v31_v8 = vrot.slane %v30_v5, 4  ;;  %v53_v11 = vlaneseq  ;;  %s190_s0 = smov [#allocation7]  }
   0x5   :  { %s137_s1 = sshll.u32 %s190_s0, 4  ;;  %s138_s1 = int_to_ptr.vmem [resolvable:$true] %s137_s1 }
   0x6   :  { %v39_v9 = vrot.slane %v38_v7, 4  ;;  %v32_v10 = vmax.f32 %v30_v5, %v31_v8  ;;  %v54_v16 = vshrl.u32 %v53_v11, 7  ;;  %s164_s17 = scalar_lea.vmem %s138_s1, 16  ;;  %s168_s18 = scalar_lea.vmem %s138_s1, 32 }
   0x7   :  { %p165_p0 = scmp.ne.s32.totalorder %s138_s1, %s164_s17  ;;  %p169_p1 = scmp.lt.s32.totalorder %s138_s1, %s138_s1 }
   0x8   :  { %v40_v12 = vmax.f32 %v38_v7, %v39_v9  ;;  %v33_v13 = vrot.slane %v32_v10, 2  ;;  %v25_v19 = vld [vmem:[#allocation2] sm:$0x1]  ;;  %v55_v22 = vsub.s32 0, %v54_v16  ;;  %v26_v23 = vld [vmem:[#allocation3] sm:$0x1]  ;;  %p170_p2 = scmp.lt.s32.totalorder %s168_s18, %s164_s17 }
   0x9   :  { %v27_v51 = vld [vmem:[#allocation4] sm:$0x1]  ;;  %v28_v4 = vld [vmem:[#allocation5] sm:$0x1] }
   0xa   :  { %v41_v14 = vrot.slane %v40_v12, 2  ;;  %v34_v15 = vmax.f32 %v32_v10, %v33_v13  ;;  %v29_v61 = vld [vmem:[#allocation6] sm:$0x1]  ;;  %p171_p3 = por %p170_p2, %p169_p1 }
   0xc   :  { %v42_v17 = vmax.f32 %v40_v12, %v41_v14  ;;  %v35_v18 = vrot.slane %v34_v15, 1  ;;  %p172_p4 = pnand %p171_p3, %p165_p0 }
   0xe   :  { %v43_v20 = vrot.slane %v42_v17, 1  ;;  %v36_v21 = vmax.f32 %v34_v15, %v35_v18 }
  0x10   :  { %v44_v24 = vmax.f32 %v42_v17, %v43_v20  ;;  %v37_v25 = vmax.f32 %v25_v19, %v36_v21 }
  0x12   :  { %v45_v26 = vmax.f32 %v26_v23, %v44_v24  ;;  %v56_v27 = vrot.slane %v37_v25, %v55_v22  ;;  %107 = vst [vmem:[#allocation2] sm:$0x1] %v37_v25  ;;  %v46_v37 = vsub.f32 %v25_v19, %v37_v25 }
  0x14   :  { %v68_v28 = vrot.slane %v45_v26, %v55_v22  ;;  %108 = vst [vmem:[#allocation3] sm:$0x1] %v45_v26  ;;  %v58_v29 = vsub.f32 %v21_v0, %v56_v27  ;;  %v59_v30 = vsub.f32 %v22_v1, %v56_v27  ;;  %v49_v38 = vsub.f32 %v26_v23, %v45_v26 }
  0x15   :  { %v47_v39 = vmul.f32 1.442695, %v46_v37  ;;  %v125_v22 = vand.u32 127, %v53_v11 }
  0x16   :  { %v70_v31 = vsub.f32 %v23_v2, %v68_v28  ;;  %v71_v32 = vsub.f32 %v24_v6, %v68_v28  ;;  %v60_v33 = vmul.f32 1.442695, %v58_v29  ;;  %v62_v34 = vmul.f32 1.442695, %v59_v30 }
  0x17   :  { %v50_v40 = vmul.f32 1.442695, %v49_v38  ;;  %v94_v58 = vmul.f32 %v49_v38, %v27_v51  ;;  %vm128_vm0 = vcmp.lt.s32.totalorder %v125_v22, 8 }
  0x18   :  { %v82_v35 = vmul.f32 1.442695, %v70_v31  ;;  %v84_v36 = vmul.f32 1.442695, %v71_v32  ;;  %148 = vpow2.f32 %v60_v33 }
  0x19   :  { %150 = vpow2.f32 %v62_v34  ;;  %v95_v5 = vadd.f32 %v94_v58, %v29_v61 }
  0x1a   :  { %152 = vpow2.f32 %v82_v35 }
  0x1b   :  { %154 = vpow2.f32 %v84_v36 }
  0x1c   :  { %156 = vpow2.f32 %v47_v39 }
  0x1d   :  { %158 = vpow2.f32 %v50_v40 }
  0x22   :  { %v149_v41 = vpop.eup %148 }
  0x23   :  { %v151_v42 = vpop.eup %150  ;;  %v97_v43 = vmul.f32 %v149_v41, %v70_v31 }
  0x24   :  { %v153_v44 = vpop.eup %152  ;;  %v98_v45 = vmul.f32 %v151_v42, %v71_v32  ;;  %v73_v46 = vadd.f32 %v151_v42, %v149_v41 }
  0x25   :  { %v155_v47 = vpop.eup %154 }
  0x26   :  { %v74_v48 = vrot.slane %v73_v46, 4  ;;  %v86_v49 = vadd.f32 %v155_v47, %v153_v44  ;;  %v99_v50 = vadd.f32 %v98_v45, %v97_v43  ;;  %v157_v63 = vpop.eup %156 }
  0x27   :  { %v159_v3 = vpop.eup %158  ;;  %v72_v6 = vmul.f32 %v157_v63, %v27_v51  ;;  %v96_v10 = vmul.f32 %v157_v63, %v95_v5 }
  0x28   :  { %v75_v52 = vadd.f32 %v74_v48, %v73_v46  ;;  %v87_v53 = vrot.slane %v86_v49, 4  ;;  %v100_v54 = vrot.slane %v99_v50, 4  ;;  %v81_v13 = vmul.f32 %v159_v3, %v28_v4 }
  0x2a   :  { %v76_v55 = vrot.slane %v75_v52, 2  ;;  %v88_v56 = vadd.f32 %v87_v53, %v86_v49  ;;  %v101_v57 = vadd.f32 %v100_v54, %v99_v50 }
  0x2c   :  { %v77_v59 = vadd.f32 %v76_v55, %v75_v52  ;;  %v89_v60 = vrot.slane %v88_v56, 2  ;;  %v102_v62 = vrot.slane %v101_v57, 2 }
  0x2e   :  { %v78_v0 = vrot.slane %v77_v59, 1  ;;  %v90_v1 = vadd.f32 %v89_v60, %v88_v56  ;;  %v103_v2 = vadd.f32 %v102_v62, %v101_v57 }
  0x30   :  { %v79_v7 = vadd.f32 %v78_v0, %v77_v59  ;;  %v91_v8 = vrot.slane %v90_v1, 1  ;;  %v104_v9 = vrot.slane %v103_v2, 1 }
  0x32   :  { %v80_v12 = vadd.f32 %v79_v7, %v72_v6  ;;  %v92_v14 = vadd.f32 %v91_v8, %v90_v1  ;;  %v105_v15 = vadd.f32 %v104_v9, %v103_v2 }
  0x34   :  { %109 = vst [vmem:[#allocation4] sm:$0x1] %v80_v12  ;;  %v93_v16 = vadd.f32 %v92_v14, %v81_v13  ;;  %v106_v17 = vadd.f32 %v105_v15, %v96_v10 }
  0x36   :  { %110 = vst [vmem:[#allocation5] sm:$0x1] %v93_v16  ;;  %111 = vst [vmem:[#allocation6] sm:$0x1] %v106_v17 }
  0x3b   :  { %v119_v18 = vld [vmem:[#allocation4] sm:$0x1] }
  0x3c   :  { %160 = vrcp.f32 %v119_v18 }
  0x3d   :  { %v115_v19 = vld [vmem:[#allocation5] sm:$0x1]  ;;  %v118_v21 = vld [vmem:[#allocation6] sm:$0x1] }
  0x3e   :  { %162 = vlog2.f32 %v115_v19 }
  0x46   :  { %v161_v20 = vpop.eup %160 }
  0x47   :  { %v121_v23 = vmul.f32 %v161_v20, %v118_v21 }
  0x48   :  { %v163_v24 = vpop.eup %162 }
  0x49   :  { %v117_v25 = vmul.f32 0.6931472, %v163_v24 }
  0x4b   :  { %v122_v26 = vsub.f32 %v117_v25, %v121_v23 }
  0x4d   :  { %v129_v27 = vsel %vm128_vm0, %v122_v26, 0.0 }
  0x4e   :  { %130 = vst [vmem:[#allocation7] sm:$0x1] %v129_v27 }
  0x4f   :  { %175 = shalt.err (!%p172_p4)
}
  0x50   :  { %s176_s21 = scalar_lea.hbm %s234_s2, 16 }
  0x51   :  { %p177_p5 = scmp.ne.s32.totalorder %s234_s2, %s176_s21  ;;  %p180_p6 = scmp.lt.u32.totalorder %s176_s21, %s234_s2 }
  0x53   :  { %p182_p7 = pnand %p180_p6, %p177_p5 }
  0x55   :  { %185 = shalt.err (!%p182_p7)
}
  0x56   :  { %140 = dma.vmem_to_hbm [thread:$0]  %s138_s1, 16, %s234_s2, [#allocation8]  }
  0x57   :  { %186 = dma.done.wait [#allocation8], 16  }
  0x58   :  { %187 = vsyncadd [#allocation8], 4294967280 }
  0x59   :  { %144 = vsyncpa [#allocation8], 1 }

</bundles_post_ra>
